<compile_context>
chip_gen: v7x
topology: tpu7x:2x2x1
jax: 0.10.0
libtpu: 0.0.40
codegen_flags: <defaults>
</compile_context>

<pallas_src>
import functools

import jax
import jax.numpy as jnp
from jax import lax
from jax.experimental import pallas as pl
from jax.experimental.pallas import tpu as pltpu

HIGHEST = lax.Precision.HIGHEST  # used only in the wrapper / pure-JAX reference


def rnn_char_kernel(ids_ref, embw_ref, whh_ref, bias_ref, fcw_ref, fcb_ref,
                    out_ref, hs_sc, *, batch, seq):
    """Single invocation processes the whole (batch, seq) problem.

    ids_ref : (S*B, 1) int32, s-major (row t*B + b holds ids[b, t])
    embw_ref: (V, D)   = emb @ W_ih   (pre-folded in the wrapper)
    whh_ref : (D, D)
    bias_ref: (1, D)   = b_ih + b_hh
    fcw_ref : (D, 1)   = fc weight column for char_index
    fcb_ref : (1, 1)   = fc bias entry for char_index
    out_ref : (S*B, 1)
    hs_sc   : (S*B, D) VMEM scratch holding all hidden states
    """
    V, D = embw_ref.shape

    # Embedding gather as an exact one-hot matmul, fused with the input projection.
    ids = ids_ref[...]                                                   # (S*B, 1)
    onehot = (ids == lax.broadcasted_iota(jnp.int32, (seq * batch, V), 1)
              ).astype(jnp.float32)                                      # (S*B, V)
    xproj = jnp.dot(onehot, embw_ref[...],
                    preferred_element_type=jnp.float32) + bias_ref[...]  # (S*B, D)

    # Batched recurrence: only h @ W_hh + tanh remain on the serial chain.
    h = jnp.zeros((batch, D), jnp.float32)
    for t in range(seq):  # seq is small & static -> unrolled; use lax.fori_loop if it grows
        h = jnp.tanh(xproj[t * batch:(t + 1) * batch, :]
                     + jnp.dot(h, whh_ref[...],
                               preferred_element_type=jnp.float32))
        hs_sc[t * batch:(t + 1) * batch, :] = h

    # Single fc projection for the selected vocab column, after the loop.
    out_ref[...] = jnp.dot(hs_sc[...], fcw_ref[...],
                           preferred_element_type=jnp.float32) + fcb_ref[...]


def torch_model_forward(x_ids, char_index, params):
    B, S = x_ids.shape
    V, D = params["emb"].shape

    # Wrapper-side precomputation (plain XLA; amortized over the batch / across calls):
    embw = jnp.dot(params["emb"], params["wih"], precision=HIGHEST)        # (V, D)
    fcw_col = lax.dynamic_slice(params["fcw"], (0, char_index), (D, 1))    # (D, 1)
    fcb_ci = lax.dynamic_slice(params["fcb"], (0, char_index), (1, 1))     # (1, 1)
    ids_sm = x_ids.T.reshape(S * B, 1).astype(jnp.int32)                   # s-major rows

    kernel = functools.partial(rnn_char_kernel, batch=B, seq=S)
    out = pl.pallas_call(
        kernel,
        out_shape=jax.ShapeDtypeStruct((S * B, 1), jnp.float32),
        grid=(1,),                               # whole batch in one step (tiny B, S)
        in_specs=[
            pl.BlockSpec((S * B, 1), lambda i: (0, 0)),   # ids (s-major)
            pl.BlockSpec((V, D), lambda i: (0, 0)),       # emb @ W_ih
            pl.BlockSpec((D, D), lambda i: (0, 0)),       # W_hh
            pl.BlockSpec((1, D), lambda i: (0, 0)),       # b_ih + b_hh
            pl.BlockSpec((D, 1), lambda i: (0, 0)),       # fc column for char_index
            pl.BlockSpec((1, 1), lambda i: (0, 0)),       # fc bias for char_index
        ],
        out_specs=pl.BlockSpec((S * B, 1), lambda i: (0, 0)),
        scratch_shapes=[pltpu.VMEM((S * B, D), jnp.float32)],
    )(ids_sm, embw, params["whh"], params["b"], fcw_col, fcb_ci)

    # Unscramble s-major rows back to (B, S) -- layout plumbing in the wrapper.
    return out.reshape(S, B).T


def reference_forward(x_ids, char_index, p):
    """Pure-JAX reference mirroring the torch forward pass (full precision)."""
    x = p["emb"][x_ids]                                   # (B, S, D)
    B, S, D = x.shape
    h = jnp.zeros((B, D), jnp.float32)
    hs = []
    for t in range(S):
        h = jnp.tanh(
            jnp.dot(x[:, t, :], p["wih"], precision=HIGHEST)
            + jnp.dot(h, p["whh"], precision=HIGHEST)
            + p["b"])
        hs.append(h)
    hs = jnp.stack(hs, axis=1)                            # (B, S, D)
    logits = jnp.einsum("bsd,dv->bsv", hs, p["fcw"],
                        precision=HIGHEST) + p["fcb"]     # (B, S, V)
    return logits[:, :, char_index]


def make_params(key, vocab_size, vector_dim):
    ks = jax.random.split(key, 6)
    emb = jax.random.normal(ks[0], (vocab_size, vector_dim), jnp.float32) * 0.1
    emb = emb.at[0].set(0.0)   # nn.Embedding padding_idx=0 zeros that row at init
    scale = 1.0 / (vector_dim ** 0.5)
    return {
        "emb": emb,
        "wih": jax.random.normal(ks[1], (vector_dim, vector_dim), jnp.float32) * scale,
        "whh": jax.random.normal(ks[2], (vector_dim, vector_dim), jnp.float32) * scale,
        # combined bias b_ih + b_hh
        "b":   jax.random.normal(ks[3], (1, vector_dim), jnp.float32) * 0.1,
        "fcw": jax.random.normal(ks[4], (vector_dim, vocab_size), jnp.float32) * scale,
        "fcb": jax.random.normal(ks[5], (1, vocab_size), jnp.float32) * 0.1,
    }


if __name__ == "__main__":
    B, S, D, V = 2, 8, 32, 16           # batch, sentence_length, vector_dim, len(vocab)
    char_index = 3

    key = jax.random.PRNGKey(0)
    k_ids, k_params = jax.random.split(key)
    params = make_params(k_params, V, D)
    x_ids = jax.random.randint(k_ids, (B, S), 0, V, dtype=jnp.int32)

    out = torch_model_forward(x_ids, char_index, params)
    out = jax.block_until_ready(out)

    ref = reference_forward(x_ids, char_index, params)
    assert out.shape == (B, S)
    # Kernel uses default (reduced) MXU precision; reference is full precision,
    # so allow bf16-class tolerance.
    assert jnp.allclose(out, ref, rtol=2e-2, atol=2e-2), (out, ref)

    print("KERNEL_OK")
</pallas_src>

<mosaic_0001>
module attributes {stable_mosaic.version = 11 : i64} {
  func.func @rnn_char_kernel(%arg0: i32, %arg1: memref<16x1xi32, #tpu.memory_space<vmem>>, %arg2: memref<16x32xf32, #tpu.memory_space<vmem>>, %arg3: memref<32x32xf32, #tpu.memory_space<vmem>>, %arg4: memref<1x32xf32, #tpu.memory_space<vmem>>, %arg5: memref<32x1xf32, #tpu.memory_space<vmem>>, %arg6: memref<1x1xf32, #tpu.memory_space<vmem>>, %arg7: memref<16x1xf32, #tpu.memory_space<vmem>>, %arg8: memref<16x32xf32, #tpu.memory_space<vmem>>) attributes {dimension_semantics = [#tpu.dimension_semantics<arbitrary>], iteration_bounds = array<i64: 1>, scalar_prefetch = 0 : i64, scratch_operands = 1 : i64, tpu.core_type = #tpu.core_type<tc>, window_params = [{pipeline_mode = #tpu.pipeline_mode<synchronous>, transform_indices = @transform_0, window_bounds = array<i64: 16, 1>}, {pipeline_mode = #tpu.pipeline_mode<synchronous>, transform_indices = @transform_1, window_bounds = array<i64: 16, 32>}, {pipeline_mode = #tpu.pipeline_mode<synchronous>, transform_indices = @transform_2, window_bounds = array<i64: 32, 32>}, {pipeline_mode = #tpu.pipeline_mode<synchronous>, transform_indices = @transform_3, window_bounds = array<i64: 1, 32>}, {pipeline_mode = #tpu.pipeline_mode<synchronous>, transform_indices = @transform_4, window_bounds = array<i64: 32, 1>}, {pipeline_mode = #tpu.pipeline_mode<synchronous>, transform_indices = @transform_5, window_bounds = array<i64: 1, 1>}, {pipeline_mode = #tpu.pipeline_mode<synchronous>, transform_indices = @transform_6, window_bounds = array<i64: 16, 1>}]} {
    %c0 = arith.constant 0 : index
    %c0_0 = arith.constant 0 : index
    %0 = vector.load %arg1[%c0, %c0_0] : memref<16x1xi32, #tpu.memory_space<vmem>>, vector<16x1xi32>
    %1 = tpu.iota {dimensions = array<i32: 1>} : vector<16x16xi32>
    %2 = vector.broadcast %0 : vector<16x1xi32> to vector<16x16xi32>
    %3 = arith.cmpi eq, %2, %1 : vector<16x16xi32>
    %4 = arith.extui %3 : vector<16x16xi1> to vector<16x16xi32>
    %5 = arith.sitofp %4 : vector<16x16xi32> to vector<16x16xf32>
    %c0_1 = arith.constant 0 : index
    %c0_2 = arith.constant 0 : index
    %6 = vector.load %arg2[%c0_1, %c0_2] : memref<16x32xf32, #tpu.memory_space<vmem>>, vector<16x32xf32>
    %cst = arith.constant dense<0.000000e+00> : vector<16x32xf32>
    %7 = tpu.matmul %5, %6, %cst {dimension_numbers = #tpu.dot_dimension_numbers<[1], [0], [0], [1], [0, 0, 1, 1], [], []>} : vector<16x16xf32>, vector<16x32xf32>, vector<16x32xf32> -> vector<16x32xf32>
    %c0_3 = arith.constant 0 : index
    %c0_4 = arith.constant 0 : index
    %8 = vector.load %arg4[%c0_3, %c0_4] : memref<1x32xf32, #tpu.memory_space<vmem>>, vector<1x32xf32>
    %9 = vector.broadcast %8 : vector<1x32xf32> to vector<16x32xf32>
    %10 = arith.addf %7, %9 : vector<16x32xf32>
    %cst_5 = arith.constant 0.000000e+00 : f32
    %11 = vector.broadcast %cst_5 : f32 to vector<2x32xf32>
    %12 = vector.extract_strided_slice %10 {offsets = [0, 0], sizes = [2, 32], strides = [1, 1]} : vector<16x32xf32> to vector<2x32xf32>
    %c0_6 = arith.constant 0 : index
    %c0_7 = arith.constant 0 : index
    %13 = vector.load %arg3[%c0_6, %c0_7] : memref<32x32xf32, #tpu.memory_space<vmem>>, vector<32x32xf32>
    %cst_8 = arith.constant dense<0.000000e+00> : vector<2x32xf32>
    %14 = tpu.matmul %11, %13, %cst_8 {dimension_numbers = #tpu.dot_dimension_numbers<[1], [0], [0], [1], [0, 0, 1, 1], [], []>} : vector<2x32xf32>, vector<32x32xf32>, vector<2x32xf32> -> vector<2x32xf32>
    %15 = arith.addf %12, %14 : vector<2x32xf32>
    %16 = math.tanh %15 : vector<2x32xf32>
    %c0_9 = arith.constant 0 : index
    %c0_10 = arith.constant 0 : index
    %17 = vector.load %arg8[%c0_9, %c0_10] : memref<16x32xf32, #tpu.memory_space<vmem>>, vector<2x32xf32>
    tpu.vector_store %arg8[%c0_9, %c0_10], %16 {strides = array<i32>} : memref<16x32xf32, #tpu.memory_space<vmem>>, vector<2x32xf32>,
    %18 = vector.extract_strided_slice %10 {offsets = [2, 0], sizes = [2, 32], strides = [1, 1]} : vector<16x32xf32> to vector<2x32xf32>
    %c0_11 = arith.constant 0 : index
    %c0_12 = arith.constant 0 : index
    %19 = vector.load %arg3[%c0_11, %c0_12] : memref<32x32xf32, #tpu.memory_space<vmem>>, vector<32x32xf32>
    %cst_13 = arith.constant dense<0.000000e+00> : vector<2x32xf32>
    %20 = tpu.matmul %16, %19, %cst_13 {dimension_numbers = #tpu.dot_dimension_numbers<[1], [0], [0], [1], [0, 0, 1, 1], [], []>} : vector<2x32xf32>, vector<32x32xf32>, vector<2x32xf32> -> vector<2x32xf32>
    %21 = arith.addf %18, %20 : vector<2x32xf32>
    %22 = math.tanh %21 : vector<2x32xf32>
    %c2 = arith.constant 2 : index
    %c0_14 = arith.constant 0 : index
    %23 = vector.load %arg8[%c2, %c0_14] : memref<16x32xf32, #tpu.memory_space<vmem>>, vector<2x32xf32>
    tpu.vector_store %arg8[%c2, %c0_14], %22 {strides = array<i32>} : memref<16x32xf32, #tpu.memory_space<vmem>>, vector<2x32xf32>,
    %24 = vector.extract_strided_slice %10 {offsets = [4, 0], sizes = [2, 32], strides = [1, 1]} : vector<16x32xf32> to vector<2x32xf32>
    %c0_15 = arith.constant 0 : index
    %c0_16 = arith.constant 0 : index
    %25 = vector.load %arg3[%c0_15, %c0_16] : memref<32x32xf32, #tpu.memory_space<vmem>>, vector<32x32xf32>
    %cst_17 = arith.constant dense<0.000000e+00> : vector<2x32xf32>
    %26 = tpu.matmul %22, %25, %cst_17 {dimension_numbers = #tpu.dot_dimension_numbers<[1], [0], [0], [1], [0, 0, 1, 1], [], []>} : vector<2x32xf32>, vector<32x32xf32>, vector<2x32xf32> -> vector<2x32xf32>
    %27 = arith.addf %24, %26 : vector<2x32xf32>
    %28 = math.tanh %27 : vector<2x32xf32>
    %c4 = arith.constant 4 : index
    %c0_18 = arith.constant 0 : index
    %29 = vector.load %arg8[%c4, %c0_18] : memref<16x32xf32, #tpu.memory_space<vmem>>, vector<2x32xf32>
    tpu.vector_store %arg8[%c4, %c0_18], %28 {strides = array<i32>} : memref<16x32xf32, #tpu.memory_space<vmem>>, vector<2x32xf32>,
    %30 = vector.extract_strided_slice %10 {offsets = [6, 0], sizes = [2, 32], strides = [1, 1]} : vector<16x32xf32> to vector<2x32xf32>
    %c0_19 = arith.constant 0 : index
    %c0_20 = arith.constant 0 : index
    %31 = vector.load %arg3[%c0_19, %c0_20] : memref<32x32xf32, #tpu.memory_space<vmem>>, vector<32x32xf32>
    %cst_21 = arith.constant dense<0.000000e+00> : vector<2x32xf32>
    %32 = tpu.matmul %28, %31, %cst_21 {dimension_numbers = #tpu.dot_dimension_numbers<[1], [0], [0], [1], [0, 0, 1, 1], [], []>} : vector<2x32xf32>, vector<32x32xf32>, vector<2x32xf32> -> vector<2x32xf32>
    %33 = arith.addf %30, %32 : vector<2x32xf32>
    %34 = math.tanh %33 : vector<2x32xf32>
    %c6 = arith.constant 6 : index
    %c0_22 = arith.constant 0 : index
    %35 = vector.load %arg8[%c6, %c0_22] : memref<16x32xf32, #tpu.memory_space<vmem>>, vector<2x32xf32>
    tpu.vector_store %arg8[%c6, %c0_22], %34 {strides = array<i32>} : memref<16x32xf32, #tpu.memory_space<vmem>>, vector<2x32xf32>,
    %36 = vector.extract_strided_slice %10 {offsets = [8, 0], sizes = [2, 32], strides = [1, 1]} : vector<16x32xf32> to vector<2x32xf32>
    %c0_23 = arith.constant 0 : index
    %c0_24 = arith.constant 0 : index
    %37 = vector.load %arg3[%c0_23, %c0_24] : memref<32x32xf32, #tpu.memory_space<vmem>>, vector<32x32xf32>
    %cst_25 = arith.constant dense<0.000000e+00> : vector<2x32xf32>
    %38 = tpu.matmul %34, %37, %cst_25 {dimension_numbers = #tpu.dot_dimension_numbers<[1], [0], [0], [1], [0, 0, 1, 1], [], []>} : vector<2x32xf32>, vector<32x32xf32>, vector<2x32xf32> -> vector<2x32xf32>
    %39 = arith.addf %36, %38 : vector<2x32xf32>
    %40 = math.tanh %39 : vector<2x32xf32>
    %c8 = arith.constant 8 : index
    %c0_26 = arith.constant 0 : index
    %41 = vector.load %arg8[%c8, %c0_26] : memref<16x32xf32, #tpu.memory_space<vmem>>, vector<2x32xf32>
    tpu.vector_store %arg8[%c8, %c0_26], %40 {strides = array<i32>} : memref<16x32xf32, #tpu.memory_space<vmem>>, vector<2x32xf32>,
    %42 = vector.extract_strided_slice %10 {offsets = [10, 0], sizes = [2, 32], strides = [1, 1]} : vector<16x32xf32> to vector<2x32xf32>
    %c0_27 = arith.constant 0 : index
    %c0_28 = arith.constant 0 : index
    %43 = vector.load %arg3[%c0_27, %c0_28] : memref<32x32xf32, #tpu.memory_space<vmem>>, vector<32x32xf32>
    %cst_29 = arith.constant dense<0.000000e+00> : vector<2x32xf32>
    %44 = tpu.matmul %40, %43, %cst_29 {dimension_numbers = #tpu.dot_dimension_numbers<[1], [0], [0], [1], [0, 0, 1, 1], [], []>} : vector<2x32xf32>, vector<32x32xf32>, vector<2x32xf32> -> vector<2x32xf32>
    %45 = arith.addf %42, %44 : vector<2x32xf32>
    %46 = math.tanh %45 : vector<2x32xf32>
    %c10 = arith.constant 10 : index
    %c0_30 = arith.constant 0 : index
    %47 = vector.load %arg8[%c10, %c0_30] : memref<16x32xf32, #tpu.memory_space<vmem>>, vector<2x32xf32>
    tpu.vector_store %arg8[%c10, %c0_30], %46 {strides = array<i32>} : memref<16x32xf32, #tpu.memory_space<vmem>>, vector<2x32xf32>,
    %48 = vector.extract_strided_slice %10 {offsets = [12, 0], sizes = [2, 32], strides = [1, 1]} : vector<16x32xf32> to vector<2x32xf32>
    %c0_31 = arith.constant 0 : index
    %c0_32 = arith.constant 0 : index
    %49 = vector.load %arg3[%c0_31, %c0_32] : memref<32x32xf32, #tpu.memory_space<vmem>>, vector<32x32xf32>
    %cst_33 = arith.constant dense<0.000000e+00> : vector<2x32xf32>
    %50 = tpu.matmul %46, %49, %cst_33 {dimension_numbers = #tpu.dot_dimension_numbers<[1], [0], [0], [1], [0, 0, 1, 1], [], []>} : vector<2x32xf32>, vector<32x32xf32>, vector<2x32xf32> -> vector<2x32xf32>
    %51 = arith.addf %48, %50 : vector<2x32xf32>
    %52 = math.tanh %51 : vector<2x32xf32>
    %c12 = arith.constant 12 : index
    %c0_34 = arith.constant 0 : index
    %53 = vector.load %arg8[%c12, %c0_34] : memref<16x32xf32, #tpu.memory_space<vmem>>, vector<2x32xf32>
    tpu.vector_store %arg8[%c12, %c0_34], %52 {strides = array<i32>} : memref<16x32xf32, #tpu.memory_space<vmem>>, vector<2x32xf32>,
    %54 = vector.extract_strided_slice %10 {offsets = [14, 0], sizes = [2, 32], strides = [1, 1]} : vector<16x32xf32> to vector<2x32xf32>
    %c0_35 = arith.constant 0 : index
    %c0_36 = arith.constant 0 : index
    %55 = vector.load %arg3[%c0_35, %c0_36] : memref<32x32xf32, #tpu.memory_space<vmem>>, vector<32x32xf32>
    %cst_37 = arith.constant dense<0.000000e+00> : vector<2x32xf32>
    %56 = tpu.matmul %52, %55, %cst_37 {dimension_numbers = #tpu.dot_dimension_numbers<[1], [0], [0], [1], [0, 0, 1, 1], [], []>} : vector<2x32xf32>, vector<32x32xf32>, vector<2x32xf32> -> vector<2x32xf32>
    %57 = arith.addf %54, %56 : vector<2x32xf32>
    %58 = math.tanh %57 : vector<2x32xf32>
    %c14 = arith.constant 14 : index
    %c0_38 = arith.constant 0 : index
    %59 = vector.load %arg8[%c14, %c0_38] : memref<16x32xf32, #tpu.memory_space<vmem>>, vector<2x32xf32>
    tpu.vector_store %arg8[%c14, %c0_38], %58 {strides = array<i32>} : memref<16x32xf32, #tpu.memory_space<vmem>>, vector<2x32xf32>,
    %c0_39 = arith.constant 0 : index
    %c0_40 = arith.constant 0 : index
    %60 = vector.load %arg8[%c0_39, %c0_40] : memref<16x32xf32, #tpu.memory_space<vmem>>, vector<16x32xf32>
    %c0_41 = arith.constant 0 : index
    %c0_42 = arith.constant 0 : index
    %61 = vector.load %arg5[%c0_41, %c0_42] : memref<32x1xf32, #tpu.memory_space<vmem>>, vector<32x1xf32>
    %cst_43 = arith.constant dense<0.000000e+00> : vector<16x1xf32>
    %62 = tpu.matmul %60, %61, %cst_43 {dimension_numbers = #tpu.dot_dimension_numbers<[1], [0], [0], [1], [0, 0, 1, 1], [], []>} : vector<16x32xf32>, vector<32x1xf32>, vector<16x1xf32> -> vector<16x1xf32>
    %c0_44 = arith.constant 0 : index
    %c0_45 = arith.constant 0 : index
    %63 = vector.load %arg6[%c0_44, %c0_45] : memref<1x1xf32, #tpu.memory_space<vmem>>, vector<1x1xf32>
    %64 = vector.broadcast %63 : vector<1x1xf32> to vector<16x1xf32>
    %65 = arith.addf %62, %64 : vector<16x1xf32>
    %c0_46 = arith.constant 0 : index
    %c0_47 = arith.constant 0 : index
    %66 = vector.load %arg7[%c0_46, %c0_47] : memref<16x1xf32, #tpu.memory_space<vmem>>, vector<16x1xf32>
    tpu.vector_store %arg7[%c0_46, %c0_47], %65 {strides = array<i32>} : memref<16x1xf32, #tpu.memory_space<vmem>>, vector<16x1xf32>,
    return
  }
  func.func @transform_0(%arg0: i32) -> (i32, i32) {
    %c0_i32 = arith.constant 0 : i32
    %c0_i32_0 = arith.constant 0 : i32
    %c0_i32_1 = arith.constant 0 : i32
    return %c0_i32, %c0_i32_0 : i32, i32
  }
  func.func @transform_1(%arg0: i32) -> (i32, i32) {
    %c0_i32 = arith.constant 0 : i32
    %c0_i32_0 = arith.constant 0 : i32
    %c0_i32_1 = arith.constant 0 : i32
    return %c0_i32, %c0_i32_0 : i32, i32
  }
  func.func @transform_2(%arg0: i32) -> (i32, i32) {
    %c0_i32 = arith.constant 0 : i32
    %c0_i32_0 = arith.constant 0 : i32
    %c0_i32_1 = arith.constant 0 : i32
    return %c0_i32, %c0_i32_0 : i32, i32
  }
  func.func @transform_3(%arg0: i32) -> (i32, i32) {
    %c0_i32 = arith.constant 0 : i32
    %c0_i32_0 = arith.constant 0 : i32
    %c0_i32_1 = arith.constant 0 : i32
    return %c0_i32, %c0_i32_0 : i32, i32
  }
  func.func @transform_4(%arg0: i32) -> (i32, i32) {
    %c0_i32 = arith.constant 0 : i32
    %c0_i32_0 = arith.constant 0 : i32
    %c0_i32_1 = arith.constant 0 : i32
    return %c0_i32, %c0_i32_0 : i32, i32
  }
  func.func @transform_5(%arg0: i32) -> (i32, i32) {
    %c0_i32 = arith.constant 0 : i32
    %c0_i32_0 = arith.constant 0 : i32
    %c0_i32_1 = arith.constant 0 : i32
    return %c0_i32, %c0_i32_0 : i32, i32
  }
  func.func @transform_6(%arg0: i32) -> (i32, i32) {
    %c0_i32 = arith.constant 0 : i32
    %c0_i32_0 = arith.constant 0 : i32
    %c0_i32_1 = arith.constant 0 : i32
    return %c0_i32, %c0_i32_0 : i32, i32
  }
}

</mosaic_0001>

<bundles_post_ra>
// kernel: tpu_custom_call.1
= control target key start
LH: loop header
LB: loop body
LE: loop exit
PB: predicated region body
PF: predicated region fallthrough
CT: control target
= control target key end

     0   :  { %v1153_v0 = vmov 0   ;;  %v1154_v3 = vmov 0.0|0.0   ;;  %vm1155_vm0 = vmmov 0   ;;  %v1156_v13 = vmov 0.0   ;;  %s1318_s0 = inlined_call_operand.vmem [shape: s32[16,1], index: 0, kind: input, shape index: {}]   ;;  %s1319_s2 = inlined_call_operand.vmem [shape: f32[32,32], index: 2, kind: input, shape index: {}]   ;;  %s1320_s1 = inlined_call_operand.vmem [shape: f32[16,32], index: 1, kind: input, shape index: {}]   ;;  %s1321_s3 = inlined_call_operand.vmem [shape: f32[1,32], index: 3, kind: input, shape index: {}]   ;;  %s1322_s4 = inlined_call_operand.vmem [shape: f32[32,1], index: 4, kind: input, shape index: {}]   ;;  %s1323_s5 = inlined_call_operand.<no memory space> [shape: f32[1,1], index: 5, kind: input, shape index: {}]   ;;  %s1324_s6 = inlined_call_operand.vmem [shape: f32[16,1], index: 6, kind: output, shape index: {}]  }
   0x1   :  { %1136 = vset.pattern.permute.xlu0 %v1153_v0  ;;  %v25_v1 = vld [vmem:[%s1318_s0] sm:$0xff]  ;;  %1076 = vmatprep.subr.bf16.mxu1 %v1154_v3  ;;  %v133_v4 = vld [vmem:[%s1319_s2 + $0x8] sm:$0xff]  ;;  %v134_v10 = vld [vmem:[%s1319_s2 + $0x10] sm:$0xff]  ;;  %v27_v14 = vlaneseq  ;;  %vm50_vm1 = vcmask 130048   ;;  %vm212_vm4 = vcmask 254976   ;;  %vm136_vm5 = vcmask 261120  }
   0x2   :  { %v132_v2 = vld [vmem:[%s1319_s2] sm:$0xff]  ;;  %30 = vperm.xlu0 %1136, %v25_v1   ;;  %v42_v6 = vld [vmem:[%s1320_s1 + $0x8] sm:$0xff]  ;;  %v135_v11 = vld [vmem:[%s1319_s2 + $0x18] sm:$0xff]  ;;  %981 = vmatprep.mubr.msk.f32.mxu1 %vm1155_vm0, %v1156_v13  ;;  %vm296_vm6 = vcmask 257026   ;;  %vm381_vm7 = vcmask 259076   ;;  %vm466_vm8 = vcmask 261126  }
   0x3   :  { %v41_v5 = vld [vmem:[%s1320_s1] sm:$0xff]  ;;  %v26_v7 = vld [vmem:[%s1318_s0 + $0x8] sm:$0xff]  ;;  %v1211_v8 = vpack.c.bf16 %v133_v4, %v132_v2  ;;  %v1220_v12 = vpack.c.bf16 %v135_v11, %v134_v10  ;;  %v28_v15 = vand.u32 127, %v27_v14  ;;  %v805_v4 = vld [vmem:[%s1322_s4 + $0x18] sm:$0xff]  ;;  %vm894_vm9 = vcmask 7168  }
   0x4   :  { %v1072_v9 = vpack.c.bf16 %v42_v6, %v41_v5  ;;  %v903_v22 = vld [vmem:[%s1321_s3] ss:$0 sm:$0xff]  ;;  %v803_v1 = vld [vmem:[%s1322_s4 + $0x8] sm:$0xff]  ;;  %v11_v6 = vstv %s1323_s5 }
   0x5   :  { %1078 = vmatpush3.bf16.msra.mxu1 %v1211_v8  ;;  %v802_v0 = vld [vmem:[%s1322_s4] sm:$0xff]  ;;  %12 = vst [vmem:[#allocation3] sm:$0x1] %v11_v6 }
   0x6   :  { %1073 = vmatprep.subr.bf16.mxu0 %v1072_v9  ;;  %33 = vperm.xlu0 %1136, %v26_v7   ;;  %v1124_v2 = vpack.c.bf16 %v803_v1, %v802_v0 }
   0x7   :  { %1075 = vmatpush3.bf16.msra.mxu0 %v1072_v9  ;;  %1079 = vmatprep.subr.bf16.mxu1 %v1154_v3 }
   0x8   :  { %1082 = vmatprep.subr.bf16.mxu0 %v1154_v3 }
   0x9   :  { %1081 = vmatpush3.bf16.msra.mxu1 %v1220_v12 }
   0xa   :  { %1088 = vmatprep.subr.bf16.mxu1 %v1154_v3 }
   0xc   :  { %982 = vmatmul.mubr.f32.vlgmr.msra.gmra.mrb[0].mxu1 %v1156_v13 }
   0xd   :  { %1090 = vmatpush3.bf16.msra.mxu1 %v1211_v8  ;;  %1003 = vmatprep.mubr.msk.f32.mxu1 %vm1155_vm0, %v1156_v13 }
   0xe   :  { %1091 = vmatprep.subr.bf16.mxu1 %v1154_v3 }
  0x11   :  { %1093 = vmatpush3.bf16.msra.mxu1 %v1220_v12 }
  0x12   :  { %1100 = vmatprep.subr.bf16.mxu1 %v1154_v3 }
  0x81   :  { %v31_v16 = vpop.permute.xlu0 %30 }
  0x82   :  { %vm35_vm2 = vcmp.eq.s32.totalorder %v31_v16, %v28_v15 }
  0x83   :  { %v901_v17 = vsel %vm35_vm2, 1.0, %v1156_v13 }
  0x84   :  { %970 = vmatprep.mubr.msk.f32.mxu0 %vm50_vm1, %v901_v17 }
  0x85   :  { %v34_v18 = vpop.permute.xlu0 %33 }
  0x86   :  { %vm36_vm3 = vcmp.eq.s32.totalorder %v34_v18, %v28_v15 }
  0x87   :  { %v902_v19 = vsel %vm36_vm3, 1.0, %v1156_v13 }
  0x88   :  { %971 = vmatmul.mubr.msk.f32.vlgmr.msra.gmra.mrb[0].mxu0 %vm50_vm1, %v902_v19 }
  0x89   :  { %1084 = vmatpush3.bf16.msra.mxu0 %v1211_v8  ;;  %992 = vmatprep.mubr.msk.f32.mxu0 %vm1155_vm0, %v1156_v13 }
  0x8a   :  { %1085 = vmatprep.subr.bf16.mxu0 %v1154_v3 }
  0x8d   :  { %1087 = vmatpush3.bf16.msra.mxu0 %v1220_v12 }
  0x8e   :  { %1094 = vmatprep.subr.bf16.mxu0 %v1154_v3 }
  0xdf   :  { %v206_v20 = vpop.f32.mrb[0].mxu1 }
  0xe0   :  { %v983_v21 = vpop.f32.mrb[1].mxu1 }
 0x15b   :  { %v972_v23 = vpop.f32.mrb[0].mxu0 }
 0x15c   :  { %v1246_v24 = vadd.f32 %v972_v23, %v903_v22  ;;  %v123_v25 = vpop.f32.mrb[1].mxu0 }
 0x15d   :  { %v124_v26 = vadd.f32 %v903_v22, %v123_v25 }
 0x15f   :  { %v210_v27 = vadd.f32 %v206_v20, %v124_v26 }
 0x161   :  { %1137 = vtanh.f32 %v210_v27 }
 0x16b   :  { %v1138_v28 = vpop.eup %1137 }
 0x16c   :  { %213 = vst.msk [vmem:[#allocation2] sm:$0x3] %vm212_vm4, %v1138_v28  ;;  %993 = vmatmul.mubr.msk.f32.vlgmr.msra.gmra.mrb[2].mxu0 %vm136_vm5, %v1138_v28 }
 0x16d   :  { %1096 = vmatpush3.bf16.msra.mxu0 %v1211_v8  ;;  %1014 = vmatprep.mubr.msk.f32.mxu0 %vm1155_vm0, %v1156_v13 }
 0x16e   :  { %1097 = vmatprep.subr.bf16.mxu0 %v1154_v3 }
 0x171   :  { %1099 = vmatpush3.bf16.msra.mxu0 %v1220_v12 }
 0x172   :  { %1106 = vmatprep.subr.bf16.mxu0 %v1154_v3 }
 0x23f   :  { %v287_v29 = vpop.f32.mrb[2].mxu0 }
 0x240   :  { %v292_v30 = vrot.slane %v287_v29, 6  ;;  %v994_v31 = vpop.f32.mrb[3].mxu0 }
 0x242   :  { %v294_v32 = vadd.f32 %v292_v30, %v124_v26 }
 0x244   :  { %1139 = vtanh.f32 %v294_v32 }
 0x24e   :  { %v1140_v33 = vpop.eup %1139 }
 0x24f   :  { %297 = vst.msk [vmem:[#allocation2] sm:$0xc] %vm296_vm6, %v1140_v33  ;;  %v303_v34 = vrot.slane %v1140_v33, 2 }
 0x251   :  { %1004 = vmatmul.mubr.msk.f32.vlgmr.msra.gmra.mrb[2].mxu1 %vm136_vm5, %v303_v34 }
 0x252   :  { %1102 = vmatpush3.bf16.msra.mxu1 %v1211_v8  ;;  %1025 = vmatprep.mubr.msk.f32.mxu1 %vm1155_vm0, %v1156_v13 }
 0x253   :  { %1103 = vmatprep.subr.bf16.mxu1 %v1154_v3 }
 0x256   :  { %1105 = vmatpush3.bf16.msra.mxu1 %v1220_v12 }
 0x257   :  { %1112 = vmatprep.subr.bf16.mxu1 %v1154_v3 }
 0x324   :  { %v372_v35 = vpop.f32.mrb[2].mxu1 }
 0x325   :  { %v377_v36 = vrot.slane %v372_v35, 4  ;;  %v1005_v37 = vpop.f32.mrb[3].mxu1 }
 0x327   :  { %v379_v38 = vadd.f32 %v377_v36, %v124_v26 }
 0x329   :  { %1141 = vtanh.f32 %v379_v38 }
 0x333   :  { %v1142_v39 = vpop.eup %1141 }
 0x334   :  { %382 = vst.msk [vmem:[#allocation2] sm:$0x30] %vm381_vm7, %v1142_v39  ;;  %v388_v40 = vrot.slane %v1142_v39, 4 }
 0x336   :  { %1015 = vmatmul.mubr.msk.f32.vlgmr.msra.gmra.mrb[4].mxu0 %vm136_vm5, %v388_v40 }
 0x337   :  { %1108 = vmatpush3.bf16.msra.mxu0 %v1211_v8  ;;  %1036 = vmatprep.mubr.msk.f32.mxu0 %vm1155_vm0, %v1156_v13 }
 0x338   :  { %1109 = vmatprep.subr.bf16.mxu0 %v1154_v3 }
 0x33b   :  { %1111 = vmatpush3.bf16.msra.mxu0 %v1220_v12 }
 0x33c   :  { %1118 = vmatprep.subr.bf16.mxu0 %v1154_v3 }
 0x409   :  { %v457_v41 = vpop.f32.mrb[4].mxu0 }
 0x40a   :  { %v462_v42 = vrot.slane %v457_v41, 2  ;;  %v1016_v43 = vpop.f32.mrb[5].mxu0 }
 0x40c   :  { %v464_v44 = vadd.f32 %v462_v42, %v124_v26 }
 0x40e   :  { %1143 = vtanh.f32 %v464_v44 }
 0x418   :  { %v1144_v45 = vpop.eup %1143 }
 0x419   :  { %467 = vst.msk [vmem:[#allocation2] sm:$0xc0] %vm466_vm8, %v1144_v45  ;;  %v473_v46 = vrot.slane %v1144_v45, 6 }
 0x41b   :  { %1026 = vmatmul.mubr.msk.f32.vlgmr.msra.gmra.mrb[4].mxu1 %vm136_vm5, %v473_v46 }
 0x41c   :  { %1114 = vmatpush3.bf16.msra.mxu1 %v1211_v8  ;;  %1047 = vmatprep.mubr.msk.f32.mxu1 %vm1155_vm0, %v1156_v13 }
 0x41d   :  { %1115 = vmatprep.subr.bf16.mxu1 %v1154_v3 }
 0x420   :  { %1117 = vmatpush3.bf16.msra.mxu1 %v1220_v12  ;;  %v800_v57 = vld [vmem:[#allocation2] sm:$0xff] }
 0x421   :  { %1125 = vmatprep.subr.bf16.mxu1 %v1124_v2 }
 0x4ee   :  { %v542_v47 = vpop.f32.mrb[4].mxu1 }
 0x4ef   :  { %v546_v48 = vadd.f32 %v542_v47, %v1246_v24  ;;  %v1027_v49 = vpop.f32.mrb[5].mxu1 }
 0x4f1   :  { %1145 = vtanh.f32 %v546_v48 }
 0x4fb   :  { %v1146_v50 = vpop.eup %1145 }
 0x4fc   :  { %548 = vst.msk [vmem:[#allocation2 + $0x8] sm:$0x3] %vm212_vm4, %v1146_v50  ;;  %1037 = vmatmul.mubr.msk.f32.vlgmr.msra.gmra.mrb[6].mxu0 %vm136_vm5, %v1146_v50 }
 0x4fd   :  { %1120 = vmatpush3.bf16.msra.mxu0 %v1211_v8  ;;  %1058 = vmatprep.mubr.msk.f32.mxu0 %vm1155_vm0, %v1156_v13  ;;  %v913_v13 = vld [vmem:[#allocation3] ss:$0 sm:$0xff] }
 0x4fe   :  { %1121 = vmatprep.subr.bf16.mxu0 %v1154_v3  ;;  %v804_v3 = vld [vmem:[%s1322_s4 + $0x10] sm:$0xff] }
 0x4ff   :  { %v1128_v5 = vpack.c.bf16 %v805_v4, %v804_v3 }
 0x501   :  { %1123 = vmatpush3.bf16.msra.mxu0 %v1220_v12 }
 0x5cf   :  { %v622_v51 = vpop.f32.mrb[6].mxu0 }
 0x5d0   :  { %v627_v52 = vrot.slane %v622_v51, 6  ;;  %v1038_v53 = vpop.f32.mrb[7].mxu0 }
 0x5d2   :  { %v629_v54 = vadd.f32 %v627_v52, %v1246_v24 }
 0x5d4   :  { %1147 = vtanh.f32 %v629_v54 }
 0x5de   :  { %v1148_v55 = vpop.eup %1147 }
 0x5df   :  { %631 = vst.msk [vmem:[#allocation2 + $0x8] sm:$0xc] %vm296_vm6, %v1148_v55  ;;  %v637_v56 = vrot.slane %v1148_v55, 2 }
 0x5e1   :  { %1048 = vmatmul.mubr.msk.f32.vlgmr.msra.gmra.mrb[6].mxu1 %vm136_vm5, %v637_v56 }
 0x5e2   :  { %1069 = vmatprep.mubr.msk.f32.mxu1 %vm136_vm5, %v800_v57  ;;  %1127 = vmatpush3.bf16.msra.mxu1 %v1124_v2 }
 0x5e3   :  { %1129 = vmatprep.subr.bf16.mxu1 %v1128_v5 }
 0x5e6   :  { %1131 = vmatpush3.bf16.msra.mxu1 %v1128_v5 }
 0x6b4   :  { %v706_v58 = vpop.f32.mrb[6].mxu1 }
 0x6b5   :  { %v711_v59 = vrot.slane %v706_v58, 4  ;;  %v1049_v60 = vpop.f32.mrb[7].mxu1 }
 0x6b7   :  { %v713_v61 = vadd.f32 %v711_v59, %v1246_v24 }
 0x6b9   :  { %1149 = vtanh.f32 %v713_v61 }
 0x6c3   :  { %v1150_v62 = vpop.eup %1149 }
 0x6c4   :  { %715 = vst.msk [vmem:[#allocation2 + $0x8] sm:$0x30] %vm381_vm7, %v1150_v62  ;;  %v721_v63 = vrot.slane %v1150_v62, 4 }
 0x6c6   :  { %1059 = vmatmul.mubr.msk.f32.vlgmr.msra.gmra.mrb[8].mxu0 %vm136_vm5, %v721_v63 }
 0x799   :  { %v790_v7 = vpop.f32.mrb[8].mxu0 }
 0x79a   :  { %v795_v8 = vrot.slane %v790_v7, 2  ;;  %v1060_v9 = vpop.f32.mrb[9].mxu0 }
 0x79c   :  { %v797_v10 = vadd.f32 %v795_v8, %v1246_v24 }
 0x79e   :  { %1151 = vtanh.f32 %v797_v10 }
 0x7a8   :  { %v1152_v11 = vpop.eup %1151 }
 0x7a9   :  { %799 = vst.msk [vmem:[#allocation2 + $0x8] sm:$0xc0] %vm466_vm8, %v1152_v11 }
 0x7b0   :  { %v801_v12 = vld [vmem:[#allocation2 + $0x8] sm:$0xff] }
 0x7b1   :  { %1070 = vmatmul.mubr.msk.f32.vlgmr.msra.gmra.mrb[8].mxu1 %vm136_vm5, %v801_v12 }
 0x884   :  { %v1071_v14 = vpop.f32.mrb[8].mxu1 }
 0x885   :  { %v891_v15 = vadd.f32 %v1071_v14, %v913_v13  ;;  %v885_v16 = vpop.f32.mrb[9].mxu1 }
 0x886   :  { %v886_v17 = vadd.f32 %v913_v13, %v885_v16 }
 0x887   :  { %896 = vst.msk [vmem:[%s1324_s6 + $0x8] sm:$0xff] %vm894_vm9, %v891_v15 }
 0x888   :  { %895 = vst.msk [vmem:[%s1324_s6] sm:$0xff] %vm894_vm9, %v886_v17 }

</bundles_post_ra>
